<compile_context>
chip_gen: v5e
topology: v5e:2x2
jax: 0.10.0
libtpu: 0.0.40
codegen_flags: <defaults>
</compile_context>

<pallas_src>
import functools

import jax
import jax.numpy as jnp
from jax.experimental import pallas as pl
from jax.experimental.pallas import tpu as pltpu


LANE = 128            # lane width (fast axis of the flat ray index)
MAX_BLOCK_ROWS = 512  # sublane rows per grid step (512 * 128 = 65536 rays)


def _round_up(x, m):
    return ((x + m - 1) // m) * m


def _sphere_trace_kernel(cam_ref, dx_ref, dy_ref, dz_ref,
                         px_ref, py_ref, pz_ref, t_ref, hit_ref,
                         *, radius, sdf_threshold, n_iters,
                         n_pixels, n_cams, block_rows):
    """Sphere tracing for one (block_rows, LANE) tile of rays (plane layout).

    cam_ref : SMEM [3*K]              flattened camera locations
    d*_ref  : VMEM [block_rows, LANE] ray-direction coordinate planes
    p*_ref  : VMEM [block_rows, LANE] hit-point coordinate planes
    t_ref   : VMEM [block_rows, LANE] hit distance (units of the raw d)
    hit_ref : VMEM [block_rows, LANE] 1.0 if |sdf| < threshold else 0.0
    """
    dx = dx_ref[...]
    dy = dy_ref[...]
    dz = dz_ref[...]

    # Reconstruct ray origins from the tiny camera table instead of streaming
    # a broadcast [M, 3] origin array through HBM.
    i = pl.program_id(0)
    row = jax.lax.broadcasted_iota(jnp.int32, dx.shape, 0)
    lane = jax.lax.broadcasted_iota(jnp.int32, dx.shape, 1)
    m = (i * block_rows + row) * LANE + lane        # global flat ray index

    ox = jnp.zeros_like(dx)
    oy = jnp.zeros_like(dx)
    oz = jnp.zeros_like(dx)
    # K cameras is small; K compares + 3K selects per block is cheap VPU work.
    for k in range(n_cams):
        in_k = jnp.logical_and(m >= k * n_pixels, m < (k + 1) * n_pixels)
        ox = jnp.where(in_k, cam_ref[3 * k + 0], ox)
        oy = jnp.where(in_k, cam_ref[3 * k + 1], oy)
        oz = jnp.where(in_k, cam_ref[3 * k + 2], oz)

    # Single EUP rsqrt; trace in world units along the unit direction and
    # convert back to raw-d parameter units once at the end.
    inv_dn = jax.lax.rsqrt(jnp.maximum(dx * dx + dy * dy + dz * dz, 1e-24))
    ux = dx * inv_dn
    uy = dy * inv_dn
    uz = dz * inv_dn

    u = jnp.zeros_like(dx)              # world-space distance along unit dir
    px = ox
    py = oy
    pz = oz
    for _ in range(n_iters):            # small static trip count -> unrolled
        px = ox + u * ux
        py = oy + u * uy
        pz = oz + u * uz
        sdf = jnp.sqrt(px * px + py * py + pz * pz) - radius
        u = u + sdf

    px = ox + u * ux
    py = oy + u * uy
    pz = oz + u * uz
    sdf = jnp.sqrt(px * px + py * py + pz * pz) - radius

    px_ref[...] = px
    py_ref[...] = py
    pz_ref[...] = pz
    t_ref[...] = u * inv_dn
    hit_ref[...] = (jnp.abs(sdf) < sdf_threshold).astype(jnp.float32)


def octree_tracing_forward(sdf, cam_loc, object_mask, ray_directions,
                           object_bounding_sphere=1.0,
                           sdf_threshold=5e-5,
                           sphere_tracing_iters=10):
    """JAX/Pallas equivalent of OctreeTracing.forward.

    cam_loc:        [K, 3]
    object_mask:    [N]     (unused by the forward pass, kept for parity)
    ray_directions: [K, N, 3]
    returns (hit_x [K*N, 3] f32, is_hit [K*N] bool, hit_t [K*N] f32)
    """
    del sdf, object_mask  # not used in the original forward either
    K, N, _ = ray_directions.shape
    M = K * N

    rd = ray_directions.astype(jnp.float32).reshape(M, 3)

    # Flat ray index split over (sublane rows, 128 lanes).  Keep the grid
    # >= 2 steps when possible (v7x dual TensorCores), block rows a multiple
    # of 8 (or the full extent) and capped so VMEM double-buffering stays
    # small on every generation.
    R = max(1, -(-M // LANE))
    half = -(-R // 2)
    BR = min(MAX_BLOCK_ROWS, max(8, _round_up(half, 8)))
    Rp = _round_up(R, BR)
    Mp = Rp * LANE
    pad = Mp - M

    dx = jnp.pad(rd[:, 0], (0, pad)).reshape(Rp, LANE)
    dy = jnp.pad(rd[:, 1], (0, pad)).reshape(Rp, LANE)
    # Pad dz with 1.0 so padded lanes trace a benign unit ray (no overflow).
    dz = jnp.pad(rd[:, 2], (0, pad), constant_values=1.0).reshape(Rp, LANE)

    cam_flat = cam_loc.astype(jnp.float32).reshape(-1)      # [3*K] -> SMEM

    kernel = functools.partial(
        _sphere_trace_kernel,
        radius=float(object_bounding_sphere),
        sdf_threshold=float(sdf_threshold),
        n_iters=int(sphere_tracing_iters),
        n_pixels=int(N),
        n_cams=int(K),
        block_rows=int(BR),
    )

    plane = jax.ShapeDtypeStruct((Rp, LANE), jnp.float32)
    block = pl.BlockSpec((BR, LANE), lambda i: (i, 0))
    smem_spec = pl.BlockSpec(memory_space=pltpu.MemorySpace.SMEM)

    px, py, pz, t_plane, hit_plane = pl.pallas_call(
        kernel,
        out_shape=(plane, plane, plane, plane, plane),
        grid=(Rp // BR,),
        in_specs=[smem_spec, block, block, block],
        out_specs=(block, block, block, block, block),
        compiler_params=pltpu.CompilerParams(
            dimension_semantics=("parallel",)),
    )(cam_flat, dx, dy, dz)

    hit_x = jnp.stack(
        [px.reshape(-1)[:M], py.reshape(-1)[:M], pz.reshape(-1)[:M]], axis=-1)
    is_hit = hit_plane.reshape(-1)[:M] > 0.5
    hit_t = t_plane.reshape(-1)[:M]
    return hit_x, is_hit, hit_t


def _reference_forward(cam_loc, ray_directions, radius, thresh, iters):
    """Pure-JAX reference of the same sphere-tracing semantics."""
    K, N, _ = ray_directions.shape
    rays_o = jnp.broadcast_to(cam_loc[:, None, :], (K, N, 3)).reshape(-1, 3)
    rays_d = ray_directions.reshape(-1, 3).astype(jnp.float32)
    d_norm = jnp.linalg.norm(rays_d, axis=-1, keepdims=True)
    d_hat = rays_d / jnp.maximum(d_norm, 1e-12)
    u = jnp.zeros((rays_o.shape[0], 1), jnp.float32)
    for _ in range(iters):
        p = rays_o + u * d_hat
        s = jnp.linalg.norm(p, axis=-1, keepdims=True) - radius
        u = u + s
    p = rays_o + u * d_hat
    s = jnp.linalg.norm(p, axis=-1, keepdims=True) - radius
    is_hit = jnp.abs(s[:, 0]) < thresh
    hit_t = (u / jnp.maximum(d_norm, 1e-12))[:, 0]
    return p, is_hit, hit_t


if __name__ == "__main__":
    key = jax.random.PRNGKey(0)
    k1, k2 = jax.random.split(key)

    K, N = 2, 8  # K cameras, N pixels each
    # Camera locations outside the unit bounding sphere.
    cam_loc = 2.5 * jax.random.normal(k1, (K, 3), dtype=jnp.float32)
    cam_loc = cam_loc / jnp.linalg.norm(cam_loc, axis=-1, keepdims=True) * 2.5

    # Ray directions aimed near the origin (some hit, some miss).
    targets = 0.8 * jax.random.normal(k2, (K, N, 3), dtype=jnp.float32)
    ray_directions = targets - cam_loc[:, None, :]
    ray_directions = ray_directions / jnp.linalg.norm(
        ray_directions, axis=-1, keepdims=True)

    object_mask = jnp.ones((N,), dtype=bool)
    sdf_dummy = None  # forward ignores the `sdf` argument, as in PyTorch

    hit_x, is_hit, hit_t = octree_tracing_forward(
        sdf_dummy, cam_loc, object_mask, ray_directions)
    jax.block_until_ready((hit_x, is_hit, hit_t))

    # Check against the pure-JAX reference of the same math.
    ref_x, ref_hit, ref_t = _reference_forward(
        cam_loc, ray_directions, 1.0, 5e-5, 10)
    assert hit_x.shape == (K * N, 3) and hit_x.dtype == jnp.float32
    assert is_hit.shape == (K * N,) and is_hit.dtype == jnp.bool_
    assert hit_t.shape == (K * N,) and hit_t.dtype == jnp.float32
    assert jnp.allclose(hit_x, ref_x, atol=1e-4, rtol=1e-4)
    assert jnp.array_equal(is_hit, ref_hit)
    assert jnp.allclose(hit_t, ref_t, atol=1e-4, rtol=1e-4)

    print("KERNEL_OK")
</pallas_src>

<mosaic_0001>
module attributes {stable_mosaic.version = 11 : i64} {
  func.func @_sphere_trace_kernel(%arg0: i32, %arg1: memref<6xf32, #tpu.memory_space<smem>>, %arg2: memref<8x128xf32, #tpu.memory_space<vmem>>, %arg3: memref<8x128xf32, #tpu.memory_space<vmem>>, %arg4: memref<8x128xf32, #tpu.memory_space<vmem>>, %arg5: memref<8x128xf32, #tpu.memory_space<vmem>>, %arg6: memref<8x128xf32, #tpu.memory_space<vmem>>, %arg7: memref<8x128xf32, #tpu.memory_space<vmem>>, %arg8: memref<8x128xf32, #tpu.memory_space<vmem>>, %arg9: memref<8x128xf32, #tpu.memory_space<vmem>>) attributes {dimension_semantics = [#tpu.dimension_semantics<parallel>], iteration_bounds = array<i64: 1>, scalar_prefetch = 0 : i64, scratch_operands = 0 : i64, tpu.core_type = #tpu.core_type<tc>, window_params = [{transform_indices = @transform_0, window_bounds = array<i64: 6>}, {transform_indices = @transform_1, window_bounds = array<i64: 8, 128>}, {transform_indices = @transform_2, window_bounds = array<i64: 8, 128>}, {transform_indices = @transform_3, window_bounds = array<i64: 8, 128>}, {transform_indices = @transform_4, window_bounds = array<i64: 8, 128>}, {transform_indices = @transform_5, window_bounds = array<i64: 8, 128>}, {transform_indices = @transform_6, window_bounds = array<i64: 8, 128>}, {transform_indices = @transform_7, window_bounds = array<i64: 8, 128>}, {transform_indices = @transform_8, window_bounds = array<i64: 8, 128>}]} {
    %c0 = arith.constant 0 : index
    %c0_0 = arith.constant 0 : index
    %0 = vector.load %arg2[%c0, %c0_0] : memref<8x128xf32, #tpu.memory_space<vmem>>, vector<8x128xf32>
    %c0_1 = arith.constant 0 : index
    %c0_2 = arith.constant 0 : index
    %1 = vector.load %arg3[%c0_1, %c0_2] : memref<8x128xf32, #tpu.memory_space<vmem>>, vector<8x128xf32>
    %c0_3 = arith.constant 0 : index
    %c0_4 = arith.constant 0 : index
    %2 = vector.load %arg4[%c0_3, %c0_4] : memref<8x128xf32, #tpu.memory_space<vmem>>, vector<8x128xf32>
    %3 = tpu.iota {dimensions = array<i32: 0>} : vector<8x128xi32>
    %4 = tpu.iota {dimensions = array<i32: 1>} : vector<8x128xi32>
    %c8_i32 = arith.constant 8 : i32
    %5 = arith.muli %arg0, %c8_i32 : i32
    %6 = vector.broadcast %5 : i32 to vector<8x128xi32>
    %7 = arith.addi %6, %3 : vector<8x128xi32>
    %c128_i32 = arith.constant 128 : i32
    %8 = vector.broadcast %c128_i32 : i32 to vector<8x128xi32>
    %9 = arith.muli %7, %8 : vector<8x128xi32>
    %10 = arith.addi %9, %4 : vector<8x128xi32>
    %cst = arith.constant 0.000000e+00 : f32
    %11 = vector.broadcast %cst : f32 to vector<8x128xf32>
    %cst_5 = arith.constant 0.000000e+00 : f32
    %12 = vector.broadcast %cst_5 : f32 to vector<8x128xf32>
    %cst_6 = arith.constant 0.000000e+00 : f32
    %13 = vector.broadcast %cst_6 : f32 to vector<8x128xf32>
    %c0_i32 = arith.constant 0 : i32
    %14 = vector.broadcast %c0_i32 : i32 to vector<8x128xi32>
    %15 = arith.cmpi sge, %10, %14 : vector<8x128xi32>
    %c8_i32_7 = arith.constant 8 : i32
    %16 = vector.broadcast %c8_i32_7 : i32 to vector<8x128xi32>
    %17 = arith.cmpi slt, %10, %16 : vector<8x128xi32>
    %18 = arith.andi %15, %17 : vector<8x128xi1>
    %c0_8 = arith.constant 0 : index
    %19 = memref.load %arg1[%c0_8] : memref<6xf32, #tpu.memory_space<smem>>
    %20 = vector.broadcast %19 : f32 to vector<8x128xf32>
    %21 = arith.select %18, %20, %11 : vector<8x128xi1>, vector<8x128xf32>
    %c1 = arith.constant 1 : index
    %22 = memref.load %arg1[%c1] : memref<6xf32, #tpu.memory_space<smem>>
    %23 = vector.broadcast %22 : f32 to vector<8x128xf32>
    %24 = arith.select %18, %23, %12 : vector<8x128xi1>, vector<8x128xf32>
    %c2 = arith.constant 2 : index
    %25 = memref.load %arg1[%c2] : memref<6xf32, #tpu.memory_space<smem>>
    %26 = vector.broadcast %25 : f32 to vector<8x128xf32>
    %27 = arith.select %18, %26, %13 : vector<8x128xi1>, vector<8x128xf32>
    %c8_i32_9 = arith.constant 8 : i32
    %28 = vector.broadcast %c8_i32_9 : i32 to vector<8x128xi32>
    %29 = arith.cmpi sge, %10, %28 : vector<8x128xi32>
    %c16_i32 = arith.constant 16 : i32
    %30 = vector.broadcast %c16_i32 : i32 to vector<8x128xi32>
    %31 = arith.cmpi slt, %10, %30 : vector<8x128xi32>
    %32 = arith.andi %29, %31 : vector<8x128xi1>
    %c3 = arith.constant 3 : index
    %33 = memref.load %arg1[%c3] : memref<6xf32, #tpu.memory_space<smem>>
    %34 = vector.broadcast %33 : f32 to vector<8x128xf32>
    %35 = arith.select %32, %34, %21 : vector<8x128xi1>, vector<8x128xf32>
    %c4 = arith.constant 4 : index
    %36 = memref.load %arg1[%c4] : memref<6xf32, #tpu.memory_space<smem>>
    %37 = vector.broadcast %36 : f32 to vector<8x128xf32>
    %38 = arith.select %32, %37, %24 : vector<8x128xi1>, vector<8x128xf32>
    %c5 = arith.constant 5 : index
    %39 = memref.load %arg1[%c5] : memref<6xf32, #tpu.memory_space<smem>>
    %40 = vector.broadcast %39 : f32 to vector<8x128xf32>
    %41 = arith.select %32, %40, %27 : vector<8x128xi1>, vector<8x128xf32>
    %42 = arith.mulf %0, %0 : vector<8x128xf32>
    %43 = arith.mulf %1, %1 : vector<8x128xf32>
    %44 = arith.addf %42, %43 : vector<8x128xf32>
    %45 = arith.mulf %2, %2 : vector<8x128xf32>
    %46 = arith.addf %44, %45 : vector<8x128xf32>
    %cst_10 = arith.constant 1.000000e-24 : f32
    %47 = vector.broadcast %cst_10 : f32 to vector<8x128xf32>
    %48 = arith.maximumf %46, %47 : vector<8x128xf32>
    %49 = math.rsqrt %48 : vector<8x128xf32>
    %50 = arith.mulf %0, %49 : vector<8x128xf32>
    %51 = arith.mulf %1, %49 : vector<8x128xf32>
    %52 = arith.mulf %2, %49 : vector<8x128xf32>
    %cst_11 = arith.constant 0.000000e+00 : f32
    %53 = vector.broadcast %cst_11 : f32 to vector<8x128xf32>
    %54 = arith.mulf %53, %50 : vector<8x128xf32>
    %55 = arith.addf %35, %54 : vector<8x128xf32>
    %56 = arith.mulf %53, %51 : vector<8x128xf32>
    %57 = arith.addf %38, %56 : vector<8x128xf32>
    %58 = arith.mulf %53, %52 : vector<8x128xf32>
    %59 = arith.addf %41, %58 : vector<8x128xf32>
    %60 = arith.mulf %55, %55 : vector<8x128xf32>
    %61 = arith.mulf %57, %57 : vector<8x128xf32>
    %62 = arith.addf %60, %61 : vector<8x128xf32>
    %63 = arith.mulf %59, %59 : vector<8x128xf32>
    %64 = arith.addf %62, %63 : vector<8x128xf32>
    %65 = math.sqrt %64 : vector<8x128xf32>
    %cst_12 = arith.constant 1.000000e+00 : f32
    %66 = vector.broadcast %cst_12 : f32 to vector<8x128xf32>
    %67 = arith.subf %65, %66 : vector<8x128xf32>
    %68 = arith.addf %53, %67 : vector<8x128xf32>
    %69 = arith.mulf %68, %50 : vector<8x128xf32>
    %70 = arith.addf %35, %69 : vector<8x128xf32>
    %71 = arith.mulf %68, %51 : vector<8x128xf32>
    %72 = arith.addf %38, %71 : vector<8x128xf32>
    %73 = arith.mulf %68, %52 : vector<8x128xf32>
    %74 = arith.addf %41, %73 : vector<8x128xf32>
    %75 = arith.mulf %70, %70 : vector<8x128xf32>
    %76 = arith.mulf %72, %72 : vector<8x128xf32>
    %77 = arith.addf %75, %76 : vector<8x128xf32>
    %78 = arith.mulf %74, %74 : vector<8x128xf32>
    %79 = arith.addf %77, %78 : vector<8x128xf32>
    %80 = math.sqrt %79 : vector<8x128xf32>
    %cst_13 = arith.constant 1.000000e+00 : f32
    %81 = vector.broadcast %cst_13 : f32 to vector<8x128xf32>
    %82 = arith.subf %80, %81 : vector<8x128xf32>
    %83 = arith.addf %68, %82 : vector<8x128xf32>
    %84 = arith.mulf %83, %50 : vector<8x128xf32>
    %85 = arith.addf %35, %84 : vector<8x128xf32>
    %86 = arith.mulf %83, %51 : vector<8x128xf32>
    %87 = arith.addf %38, %86 : vector<8x128xf32>
    %88 = arith.mulf %83, %52 : vector<8x128xf32>
    %89 = arith.addf %41, %88 : vector<8x128xf32>
    %90 = arith.mulf %85, %85 : vector<8x128xf32>
    %91 = arith.mulf %87, %87 : vector<8x128xf32>
    %92 = arith.addf %90, %91 : vector<8x128xf32>
    %93 = arith.mulf %89, %89 : vector<8x128xf32>
    %94 = arith.addf %92, %93 : vector<8x128xf32>
    %95 = math.sqrt %94 : vector<8x128xf32>
    %cst_14 = arith.constant 1.000000e+00 : f32
    %96 = vector.broadcast %cst_14 : f32 to vector<8x128xf32>
    %97 = arith.subf %95, %96 : vector<8x128xf32>
    %98 = arith.addf %83, %97 : vector<8x128xf32>
    %99 = arith.mulf %98, %50 : vector<8x128xf32>
    %100 = arith.addf %35, %99 : vector<8x128xf32>
    %101 = arith.mulf %98, %51 : vector<8x128xf32>
    %102 = arith.addf %38, %101 : vector<8x128xf32>
    %103 = arith.mulf %98, %52 : vector<8x128xf32>
    %104 = arith.addf %41, %103 : vector<8x128xf32>
    %105 = arith.mulf %100, %100 : vector<8x128xf32>
    %106 = arith.mulf %102, %102 : vector<8x128xf32>
    %107 = arith.addf %105, %106 : vector<8x128xf32>
    %108 = arith.mulf %104, %104 : vector<8x128xf32>
    %109 = arith.addf %107, %108 : vector<8x128xf32>
    %110 = math.sqrt %109 : vector<8x128xf32>
    %cst_15 = arith.constant 1.000000e+00 : f32
    %111 = vector.broadcast %cst_15 : f32 to vector<8x128xf32>
    %112 = arith.subf %110, %111 : vector<8x128xf32>
    %113 = arith.addf %98, %112 : vector<8x128xf32>
    %114 = arith.mulf %113, %50 : vector<8x128xf32>
    %115 = arith.addf %35, %114 : vector<8x128xf32>
    %116 = arith.mulf %113, %51 : vector<8x128xf32>
    %117 = arith.addf %38, %116 : vector<8x128xf32>
    %118 = arith.mulf %113, %52 : vector<8x128xf32>
    %119 = arith.addf %41, %118 : vector<8x128xf32>
    %120 = arith.mulf %115, %115 : vector<8x128xf32>
    %121 = arith.mulf %117, %117 : vector<8x128xf32>
    %122 = arith.addf %120, %121 : vector<8x128xf32>
    %123 = arith.mulf %119, %119 : vector<8x128xf32>
    %124 = arith.addf %122, %123 : vector<8x128xf32>
    %125 = math.sqrt %124 : vector<8x128xf32>
    %cst_16 = arith.constant 1.000000e+00 : f32
    %126 = vector.broadcast %cst_16 : f32 to vector<8x128xf32>
    %127 = arith.subf %125, %126 : vector<8x128xf32>
    %128 = arith.addf %113, %127 : vector<8x128xf32>
    %129 = arith.mulf %128, %50 : vector<8x128xf32>
    %130 = arith.addf %35, %129 : vector<8x128xf32>
    %131 = arith.mulf %128, %51 : vector<8x128xf32>
    %132 = arith.addf %38, %131 : vector<8x128xf32>
    %133 = arith.mulf %128, %52 : vector<8x128xf32>
    %134 = arith.addf %41, %133 : vector<8x128xf32>
    %135 = arith.mulf %130, %130 : vector<8x128xf32>
    %136 = arith.mulf %132, %132 : vector<8x128xf32>
    %137 = arith.addf %135, %136 : vector<8x128xf32>
    %138 = arith.mulf %134, %134 : vector<8x128xf32>
    %139 = arith.addf %137, %138 : vector<8x128xf32>
    %140 = math.sqrt %139 : vector<8x128xf32>
    %cst_17 = arith.constant 1.000000e+00 : f32
    %141 = vector.broadcast %cst_17 : f32 to vector<8x128xf32>
    %142 = arith.subf %140, %141 : vector<8x128xf32>
    %143 = arith.addf %128, %142 : vector<8x128xf32>
    %144 = arith.mulf %143, %50 : vector<8x128xf32>
    %145 = arith.addf %35, %144 : vector<8x128xf32>
    %146 = arith.mulf %143, %51 : vector<8x128xf32>
    %147 = arith.addf %38, %146 : vector<8x128xf32>
    %148 = arith.mulf %143, %52 : vector<8x128xf32>
    %149 = arith.addf %41, %148 : vector<8x128xf32>
    %150 = arith.mulf %145, %145 : vector<8x128xf32>
    %151 = arith.mulf %147, %147 : vector<8x128xf32>
    %152 = arith.addf %150, %151 : vector<8x128xf32>
    %153 = arith.mulf %149, %149 : vector<8x128xf32>
    %154 = arith.addf %152, %153 : vector<8x128xf32>
    %155 = math.sqrt %154 : vector<8x128xf32>
    %cst_18 = arith.constant 1.000000e+00 : f32
    %156 = vector.broadcast %cst_18 : f32 to vector<8x128xf32>
    %157 = arith.subf %155, %156 : vector<8x128xf32>
    %158 = arith.addf %143, %157 : vector<8x128xf32>
    %159 = arith.mulf %158, %50 : vector<8x128xf32>
    %160 = arith.addf %35, %159 : vector<8x128xf32>
    %161 = arith.mulf %158, %51 : vector<8x128xf32>
    %162 = arith.addf %38, %161 : vector<8x128xf32>
    %163 = arith.mulf %158, %52 : vector<8x128xf32>
    %164 = arith.addf %41, %163 : vector<8x128xf32>
    %165 = arith.mulf %160, %160 : vector<8x128xf32>
    %166 = arith.mulf %162, %162 : vector<8x128xf32>
    %167 = arith.addf %165, %166 : vector<8x128xf32>
    %168 = arith.mulf %164, %164 : vector<8x128xf32>
    %169 = arith.addf %167, %168 : vector<8x128xf32>
    %170 = math.sqrt %169 : vector<8x128xf32>
    %cst_19 = arith.constant 1.000000e+00 : f32
    %171 = vector.broadcast %cst_19 : f32 to vector<8x128xf32>
    %172 = arith.subf %170, %171 : vector<8x128xf32>
    %173 = arith.addf %158, %172 : vector<8x128xf32>
    %174 = arith.mulf %173, %50 : vector<8x128xf32>
    %175 = arith.addf %35, %174 : vector<8x128xf32>
    %176 = arith.mulf %173, %51 : vector<8x128xf32>
    %177 = arith.addf %38, %176 : vector<8x128xf32>
    %178 = arith.mulf %173, %52 : vector<8x128xf32>
    %179 = arith.addf %41, %178 : vector<8x128xf32>
    %180 = arith.mulf %175, %175 : vector<8x128xf32>
    %181 = arith.mulf %177, %177 : vector<8x128xf32>
    %182 = arith.addf %180, %181 : vector<8x128xf32>
    %183 = arith.mulf %179, %179 : vector<8x128xf32>
    %184 = arith.addf %182, %183 : vector<8x128xf32>
    %185 = math.sqrt %184 : vector<8x128xf32>
    %cst_20 = arith.constant 1.000000e+00 : f32
    %186 = vector.broadcast %cst_20 : f32 to vector<8x128xf32>
    %187 = arith.subf %185, %186 : vector<8x128xf32>
    %188 = arith.addf %173, %187 : vector<8x128xf32>
    %189 = arith.mulf %188, %50 : vector<8x128xf32>
    %190 = arith.addf %35, %189 : vector<8x128xf32>
    %191 = arith.mulf %188, %51 : vector<8x128xf32>
    %192 = arith.addf %38, %191 : vector<8x128xf32>
    %193 = arith.mulf %188, %52 : vector<8x128xf32>
    %194 = arith.addf %41, %193 : vector<8x128xf32>
    %195 = arith.mulf %190, %190 : vector<8x128xf32>
    %196 = arith.mulf %192, %192 : vector<8x128xf32>
    %197 = arith.addf %195, %196 : vector<8x128xf32>
    %198 = arith.mulf %194, %194 : vector<8x128xf32>
    %199 = arith.addf %197, %198 : vector<8x128xf32>
    %200 = math.sqrt %199 : vector<8x128xf32>
    %cst_21 = arith.constant 1.000000e+00 : f32
    %201 = vector.broadcast %cst_21 : f32 to vector<8x128xf32>
    %202 = arith.subf %200, %201 : vector<8x128xf32>
    %203 = arith.addf %188, %202 : vector<8x128xf32>
    %204 = arith.mulf %203, %50 : vector<8x128xf32>
    %205 = arith.addf %35, %204 : vector<8x128xf32>
    %206 = arith.mulf %203, %51 : vector<8x128xf32>
    %207 = arith.addf %38, %206 : vector<8x128xf32>
    %208 = arith.mulf %203, %52 : vector<8x128xf32>
    %209 = arith.addf %41, %208 : vector<8x128xf32>
    %210 = arith.mulf %205, %205 : vector<8x128xf32>
    %211 = arith.mulf %207, %207 : vector<8x128xf32>
    %212 = arith.addf %210, %211 : vector<8x128xf32>
    %213 = arith.mulf %209, %209 : vector<8x128xf32>
    %214 = arith.addf %212, %213 : vector<8x128xf32>
    %215 = math.sqrt %214 : vector<8x128xf32>
    %cst_22 = arith.constant 1.000000e+00 : f32
    %216 = vector.broadcast %cst_22 : f32 to vector<8x128xf32>
    %217 = arith.subf %215, %216 : vector<8x128xf32>
    %c0_23 = arith.constant 0 : index
    %c0_24 = arith.constant 0 : index
    %218 = vector.load %arg5[%c0_23, %c0_24] : memref<8x128xf32, #tpu.memory_space<vmem>>, vector<8x128xf32>
    tpu.vector_store %arg5[%c0_23, %c0_24], %205 {strides = array<i32>} : memref<8x128xf32, #tpu.memory_space<vmem>>, vector<8x128xf32>,
    %c0_25 = arith.constant 0 : index
    %c0_26 = arith.constant 0 : index
    %219 = vector.load %arg6[%c0_25, %c0_26] : memref<8x128xf32, #tpu.memory_space<vmem>>, vector<8x128xf32>
    tpu.vector_store %arg6[%c0_25, %c0_26], %207 {strides = array<i32>} : memref<8x128xf32, #tpu.memory_space<vmem>>, vector<8x128xf32>,
    %c0_27 = arith.constant 0 : index
    %c0_28 = arith.constant 0 : index
    %220 = vector.load %arg7[%c0_27, %c0_28] : memref<8x128xf32, #tpu.memory_space<vmem>>, vector<8x128xf32>
    tpu.vector_store %arg7[%c0_27, %c0_28], %209 {strides = array<i32>} : memref<8x128xf32, #tpu.memory_space<vmem>>, vector<8x128xf32>,
    %221 = arith.mulf %203, %49 : vector<8x128xf32>
    %c0_29 = arith.constant 0 : index
    %c0_30 = arith.constant 0 : index
    %222 = vector.load %arg8[%c0_29, %c0_30] : memref<8x128xf32, #tpu.memory_space<vmem>>, vector<8x128xf32>
    tpu.vector_store %arg8[%c0_29, %c0_30], %221 {strides = array<i32>} : memref<8x128xf32, #tpu.memory_space<vmem>>, vector<8x128xf32>,
    %223 = math.absf %217 : vector<8x128xf32>
    %cst_31 = arith.constant 5.000000e-05 : f32
    %224 = vector.broadcast %cst_31 : f32 to vector<8x128xf32>
    %225 = arith.cmpf olt, %223, %224 : vector<8x128xf32>
    %226 = arith.extui %225 : vector<8x128xi1> to vector<8x128xi32>
    %227 = arith.sitofp %226 : vector<8x128xi32> to vector<8x128xf32>
    %c0_32 = arith.constant 0 : index
    %c0_33 = arith.constant 0 : index
    %228 = vector.load %arg9[%c0_32, %c0_33] : memref<8x128xf32, #tpu.memory_space<vmem>>, vector<8x128xf32>
    tpu.vector_store %arg9[%c0_32, %c0_33], %227 {strides = array<i32>} : memref<8x128xf32, #tpu.memory_space<vmem>>, vector<8x128xf32>,
    return
  }
  func.func @transform_0(%arg0: i32) -> i32 {
    %c0_i32 = arith.constant 0 : i32
    %c0_i32_0 = arith.constant 0 : i32
    return %c0_i32 : i32
  }
  func.func @transform_1(%arg0: i32) -> (i32, i32) {
    %c0_i32 = arith.constant 0 : i32
    %c0_i32_0 = arith.constant 0 : i32
    return %arg0, %c0_i32 : i32, i32
  }
  func.func @transform_2(%arg0: i32) -> (i32, i32) {
    %c0_i32 = arith.constant 0 : i32
    %c0_i32_0 = arith.constant 0 : i32
    return %arg0, %c0_i32 : i32, i32
  }
  func.func @transform_3(%arg0: i32) -> (i32, i32) {
    %c0_i32 = arith.constant 0 : i32
    %c0_i32_0 = arith.constant 0 : i32
    return %arg0, %c0_i32 : i32, i32
  }
  func.func @transform_4(%arg0: i32) -> (i32, i32) {
    %c0_i32 = arith.constant 0 : i32
    %c0_i32_0 = arith.constant 0 : i32
    return %arg0, %c0_i32 : i32, i32
  }
  func.func @transform_5(%arg0: i32) -> (i32, i32) {
    %c0_i32 = arith.constant 0 : i32
    %c0_i32_0 = arith.constant 0 : i32
    return %arg0, %c0_i32 : i32, i32
  }
  func.func @transform_6(%arg0: i32) -> (i32, i32) {
    %c0_i32 = arith.constant 0 : i32
    %c0_i32_0 = arith.constant 0 : i32
    return %arg0, %c0_i32 : i32, i32
  }
  func.func @transform_7(%arg0: i32) -> (i32, i32) {
    %c0_i32 = arith.constant 0 : i32
    %c0_i32_0 = arith.constant 0 : i32
    return %arg0, %c0_i32 : i32, i32
  }
  func.func @transform_8(%arg0: i32) -> (i32, i32) {
    %c0_i32 = arith.constant 0 : i32
    %c0_i32_0 = arith.constant 0 : i32
    return %arg0, %c0_i32 : i32, i32
  }
}

</mosaic_0001>

<bundles_post_ra>
// kernel: tpu_custom_call.1
= control target key start
LH: loop header
LB: loop body
LE: loop exit
PB: predicated region body
PF: predicated region fallthrough
CT: control target
= control target key end

     0   :  { %14 = vsyncpa [#allocation5], 0  ;;  %s940_s0 = inlined_call_operand.hbm [shape: f32[6], index: 0, kind: input, shape index: {}]   ;;  %s941_s1 = inlined_call_operand.hbm [shape: f32[8,128], index: 1, kind: input, shape index: {}]   ;;  %s942_s2 = inlined_call_operand.hbm [shape: f32[8,128], index: 2, kind: input, shape index: {}]   ;;  %s943_s3 = inlined_call_operand.hbm [shape: f32[8,128], index: 3, kind: input, shape index: {}]   ;;  %s944_s4 = inlined_call_operand.hbm [shape: f32[8,128], index: 4, kind: output, shape index: {0}]   ;;  %s945_s5 = inlined_call_operand.hbm [shape: f32[8,128], index: 5, kind: output, shape index: {1}]   ;;  %s946_s6 = inlined_call_operand.hbm [shape: f32[8,128], index: 6, kind: output, shape index: {2}]   ;;  %s947_s7 = inlined_call_operand.hbm [shape: f32[8,128], index: 7, kind: output, shape index: {3}]   ;;  %s948_s8 = inlined_call_operand.hbm [shape: f32[8,128], index: 8, kind: output, shape index: {4}]  }
   0x1   :  { %15 = vsyncpa [#allocation3], 0 }
   0x2   :  { %16 = vsyncpa [#allocation8], 0 }
   0x3   :  { %17 = vsyncpa [#allocation4], 0 }
   0x4   :  { %18 = vsyncpa [#allocation12], 0  ;;  %s45_s29 = sshll.u32 %s942_s2, 4  ;;  %s46_s29 = int_to_ptr.hbm [resolvable:$true] %s45_s29 }
   0x5   :  { %19 = vsyncpa [#allocation15], 0  ;;  %s766_s30 = smov [#allocation7]   ;;  %s25_s12 = sshll.u32 %s940_s0, 4  ;;  %s26_s12 = int_to_ptr.hbm [resolvable:$true] %s25_s12 }
   0x6   :  { %s47_s9 = sshll.u32 %s766_s30, 4  ;;  %s767_s13 = smov [#allocation2]   ;;  %s48_s9 = int_to_ptr.vmem [resolvable:$true] %s47_s9 }
   0x7   :  { %50 = dma.hbm_to_vmem [thread:$0]  %s46_s29, 128, %s48_s9, [#allocation8]  }
   0x8   :  { %28 = dma.hbm_to_smem %s26_s12, 16, %s767_s13, [#allocation5]  }
   0x9   :  { %s34_s16 = sshll.u32 %s941_s1, 4  ;;  %s768_s17 = smov [#allocation6]   ;;  %s35_s16 = int_to_ptr.hbm [resolvable:$true] %s34_s16 }
   0xa   :  { %s36_s2 = sshll.u32 %s768_s17, 4  ;;  %s56_s20 = sshll.u32 %s943_s3, 4  ;;  %s37_s2 = int_to_ptr.vmem [resolvable:$true] %s36_s2  ;;  %s57_s20 = int_to_ptr.hbm [resolvable:$true] %s56_s20 }
   0xb   :  { %39 = dma.hbm_to_vmem [thread:$0]  %s35_s16, 128, %s37_s2, [#allocation3]  }
   0xc   :  { %s769_s21 = smov [#allocation9]  }
   0xd   :  { %s58_s0 = sshll.u32 %s769_s21, 4  ;;  %s59_s0 = int_to_ptr.vmem [resolvable:$true] %s58_s0 }
   0xe   :  { %61 = dma.hbm_to_vmem [thread:$0]  %s57_s20, 128, %s59_s0, [#allocation8]  }
   0xf   :  { %754 = dma.done.wait [#allocation5], 16  }
  0x10   :  { %755 = vsyncadd [#allocation5], 4294967280 }
  0x11   :  { %756 = dma.done.wait [#allocation3], 128  }
  0x12   :  { %757 = vsyncadd [#allocation3], 4294967168 }
  0x13   :  { %758 = dma.done.wait [#allocation8], 256  }
  0x14   :  { %759 = vsyncadd [#allocation8], 4294967040 }
  0x15   :  { %78 = sfence }
  0x16   :  { %v79_v0 = vld [vmem:[#allocation6] sm:$0xff]  ;;  %v80_v1 = vld [vmem:[#allocation7] sm:$0xff]  ;;  %v81_v2 = vld [vmem:[#allocation9] sm:$0xff]  ;;  %v82_v6 = vlaneseq  ;;  %s94_s1 = sld [smem:[#allocation2]]  ;;  %s770_s26 = smov [#allocation11]  }
  0x17   :  { %v115_v3 = vmul.f32 %v79_v0, %v79_v0  ;;  %v116_v4 = vmul.f32 %v80_v1, %v80_v1  ;;  %v118_v5 = vmul.f32 %v81_v2, %v81_v2  ;;  %s499_s3 = sld [smem:[#allocation2 + $0x1]]  ;;  %s910_s27 = sshll.u32 %s770_s26, 4  ;;  %s435_s27 = int_to_ptr.vmem [resolvable:$true] %s910_s27 }
  0x18   :  { %v83_v9 = vshrl.u32 %v82_v6, 7  ;;  %v85_v11 = vand.u32 127, %v82_v6  ;;  %s500_s22 = sld [smem:[#allocation2 + $0x2]]  ;;  %s436_s30 = sshll.u32 %s945_s5, 4  ;;  %s437_s30 = int_to_ptr.hbm [resolvable:$true] %s436_s30 }
  0x19   :  { %v117_v7 = vadd.f32 %v116_v4, %v115_v3  ;;  %s501_s23 = sld [smem:[#allocation2 + $0x3]]  ;;  %s771_s9 = smov [#allocation14]  }
  0x1a   :  { %v89_v12 = vmul.u32 128, %v83_v9  ;;  %s502_s24 = sld [smem:[#allocation2 + $0x4]]  ;;  %s456_s10 = sshll.u32 %s771_s9, 4  ;;  %s457_s10 = int_to_ptr.vmem [resolvable:$true] %s456_s10 }
  0x1b   :  { %v119_v8 = vadd.f32 %v118_v5, %v117_v7  ;;  %s503_s25 = sld [smem:[#allocation2 + $0x5]]  ;;  %s458_s13 = sshll.u32 %s947_s7, 4  ;;  %s459_s13 = int_to_ptr.hbm [resolvable:$true] %s458_s13 }
  0x1c   :  { %v90_v13 = vadd.s32 %v89_v12, %v85_v11  ;;  %v95_v18 = vstv %s94_s1  ;;  %s772_s14 = smov [#allocation10]   ;;  %s425_s2 = sshll.u32 %s944_s4, 4  ;;  %s426_s2 = int_to_ptr.hbm [resolvable:$true] %s425_s2 }
  0x1d   :  { %v120_v10 = vmax.f32 %v119_v8, 1e-24  ;;  %v98_v19 = vstv %s499_s3  ;;  %s919_s15 = sshll.u32 %s772_s14, 4  ;;  %s773_s5 = smov [#allocation13]   ;;  %s424_s15 = int_to_ptr.vmem [resolvable:$true] %s919_s15 }
  0x1e   :  { %vm91_vm0 = vcmp.ge.s32.totalorder %v90_v13, 0  ;;  %vm92_vm1 = vcmp.lt.s32.totalorder %v90_v13, 8  ;;  %v101_v20 = vstv %s500_s22  ;;  %vm103_vm5 = vcmp.ge.s32.totalorder %v90_v13, 8  ;;  %s445_s7 = sshll.u32 %s773_s5, 4  ;;  %s447_s20 = sshll.u32 %s946_s6, 4  ;;  %s446_s7 = int_to_ptr.vmem [resolvable:$true] %s445_s7  ;;  %s448_s20 = int_to_ptr.hbm [resolvable:$true] %s447_s20 }
  0x1f   :  { %526 = vrsqrt.f32 %v120_v10  ;;  %vm127_vm2 = vweird.f32 %v120_v10  ;;  %vm93_vm4 = vmand %vm91_vm0, %vm92_vm1  ;;  %vm104_vm6 = vcmp.lt.s32.totalorder %v90_v13, 16  ;;  %v107_v23 = vstv %s501_s23  ;;  %s774_s4 = smov [#allocation16]   ;;  %s469_s1 = sshll.u32 %s948_s8, 4  ;;  %s470_s1 = int_to_ptr.hbm [resolvable:$true] %s469_s1 }
  0x20   :  { %v96_v22 = vsel %vm93_vm4, %v95_v18, 0.0  ;;  %v99_v25 = vsel %vm93_vm4, %v98_v19, 0.0  ;;  %v102_v26 = vsel %vm93_vm4, %v101_v20, 0.0  ;;  %vm105_vm8 = vmand %vm103_vm5, %vm104_vm6  ;;  %v110_v27 = vstv %s502_s24  ;;  %s467_s6 = sshll.u32 %s774_s4, 4  ;;  %s468_s6 = int_to_ptr.vmem [resolvable:$true] %s467_s6 }
  0x21   :  { %v113_v28 = vstv %s503_s25  ;;  %v844_v33 = vsel %vm105_vm8, %v107_v23, %v96_v22  ;;  %v846_v34 = vsel %vm105_vm8, %v110_v27, %v99_v25 }
  0x22   :  { %v848_v35 = vsel %vm105_vm8, %v113_v28, %v102_v26 }
  0x25   :  { %v527_v14 = vpop.eup %526 }
  0x26   :  { %v122_v15 = vmul.f32 %v527_v14, %v120_v10  ;;  %vm128_vm3 = vweird.f32 %v527_v14 }
  0x27   :  { %vm129_vm7 = vmor %vm127_vm2, %vm128_vm3 }
  0x28   :  { %v123_v16 = vmul.f32 %v527_v14, %v122_v15 }
  0x2a   :  { %v124_v17 = vmul.f32 0.5, %v123_v16 }
  0x2c   :  { %v125_v21 = vsub.f32 1.5, %v124_v17 }
  0x2e   :  { %v126_v24 = vmul.f32 %v527_v14, %v125_v21 }
  0x30   :  { %v833_v29 = vsel %vm129_vm7, %v527_v14, %v126_v24 }
  0x31   :  { %v836_v30 = vmul.f32 %v833_v29, %v79_v0  ;;  %v839_v31 = vmul.f32 %v833_v29, %v80_v1  ;;  %v842_v32 = vmul.f32 %v833_v29, %v81_v2 }
  0x33   :  { %v134_v36 = vmul.f32 0.0, %v836_v30  ;;  %v136_v37 = vmul.f32 0.0, %v839_v31  ;;  %v138_v38 = vmul.f32 0.0, %v842_v32 }
  0x35   :  { %v135_v39 = vadd.f32 %v134_v36, %v844_v33  ;;  %v137_v40 = vadd.f32 %v136_v37, %v846_v34  ;;  %v139_v41 = vadd.f32 %v138_v38, %v848_v35 }
  0x37   :  { %v140_v42 = vmul.f32 %v135_v39, %v135_v39  ;;  %v141_v43 = vmul.f32 %v137_v40, %v137_v40  ;;  %v143_v44 = vmul.f32 %v139_v41, %v139_v41 }
  0x39   :  { %v142_v45 = vadd.f32 %v141_v43, %v140_v42 }
  0x3b   :  { %v144_v46 = vadd.f32 %v143_v44, %v142_v45 }
  0x3d   :  { %528 = vrsqrt.f32 %v144_v46  ;;  %vm152_vm9 = vcmp.eq.f32.partialorder %v144_v46, inf  ;;  %v155_v53 = vand.u32 2147483648, %v144_v46  ;;  %vm154_vm10 = vcmp.eq.f32.partialorder %v144_v46, 0.0 }
  0x43   :  { %v529_v47 = vpop.eup %528 }
  0x44   :  { %v146_v48 = vmul.f32 %v529_v47, %v144_v46 }
  0x46   :  { %v147_v49 = vmul.f32 %v529_v47, %v146_v48 }
  0x48   :  { %v148_v50 = vmul.f32 0.5, %v147_v49 }
  0x4a   :  { %v149_v51 = vsub.f32 1.5, %v148_v50 }
  0x4c   :  { %v150_v52 = vmul.f32 %v529_v47, %v149_v51 }
  0x4e   :  { %v151_v54 = vmul.f32 %v150_v52, %v144_v46 }
  0x50   :  { %v153_v55 = vsel %vm152_vm9, %v144_v46, %v151_v54 }
  0x51   :  { %v156_v56 = vsel %vm154_vm10, %v155_v53, %v153_v55 }
  0x52   :  { %v504_v57 = vadd.f32 -1.0, %v156_v56 }
  0x54   :  { %v159_v58 = vmul.f32 %v504_v57, %v836_v30  ;;  %v161_v59 = vmul.f32 %v504_v57, %v839_v31  ;;  %v163_v60 = vmul.f32 %v504_v57, %v842_v32 }
  0x56   :  { %v160_v61 = vadd.f32 %v159_v58, %v844_v33  ;;  %v162_v62 = vadd.f32 %v161_v59, %v846_v34  ;;  %v164_v63 = vadd.f32 %v163_v60, %v848_v35 }
  0x58   :  { %v165_v0 = vmul.f32 %v160_v61, %v160_v61  ;;  %v166_v1 = vmul.f32 %v162_v62, %v162_v62  ;;  %v168_v2 = vmul.f32 %v164_v63, %v164_v63 }
  0x5a   :  { %v167_v3 = vadd.f32 %v166_v1, %v165_v0 }
  0x5c   :  { %v169_v4 = vadd.f32 %v168_v2, %v167_v3 }
  0x5e   :  { %530 = vrsqrt.f32 %v169_v4  ;;  %vm177_vm11 = vcmp.eq.f32.partialorder %v169_v4, inf  ;;  %v180_v11 = vand.u32 2147483648, %v169_v4  ;;  %vm179_vm12 = vcmp.eq.f32.partialorder %v169_v4, 0.0 }
  0x64   :  { %v531_v5 = vpop.eup %530 }
  0x65   :  { %v171_v6 = vmul.f32 %v531_v5, %v169_v4 }
  0x67   :  { %v172_v7 = vmul.f32 %v531_v5, %v171_v6 }
  0x69   :  { %v173_v8 = vmul.f32 0.5, %v172_v7 }
  0x6b   :  { %v174_v9 = vsub.f32 1.5, %v173_v8 }
  0x6d   :  { %v175_v10 = vmul.f32 %v531_v5, %v174_v9 }
  0x6f   :  { %v176_v12 = vmul.f32 %v175_v10, %v169_v4 }
  0x71   :  { %v178_v13 = vsel %vm177_vm11, %v169_v4, %v176_v12 }
  0x72   :  { %v181_v14 = vsel %vm179_vm12, %v180_v11, %v178_v13 }
  0x73   :  { %v505_v15 = vadd.f32 -1.0, %v181_v14 }
  0x75   :  { %v183_v16 = vadd.f32 %v505_v15, %v504_v57 }
  0x77   :  { %v184_v17 = vmul.f32 %v183_v16, %v836_v30  ;;  %v186_v18 = vmul.f32 %v183_v16, %v839_v31  ;;  %v188_v19 = vmul.f32 %v183_v16, %v842_v32 }
  0x79   :  { %v185_v20 = vadd.f32 %v184_v17, %v844_v33  ;;  %v187_v21 = vadd.f32 %v186_v18, %v846_v34  ;;  %v189_v22 = vadd.f32 %v188_v19, %v848_v35 }
  0x7b   :  { %v190_v23 = vmul.f32 %v185_v20, %v185_v20  ;;  %v191_v24 = vmul.f32 %v187_v21, %v187_v21  ;;  %v193_v25 = vmul.f32 %v189_v22, %v189_v22 }
  0x7d   :  { %v192_v26 = vadd.f32 %v191_v24, %v190_v23 }
  0x7f   :  { %v194_v27 = vadd.f32 %v193_v25, %v192_v26 }
  0x81   :  { %532 = vrsqrt.f32 %v194_v27  ;;  %vm202_vm13 = vcmp.eq.f32.partialorder %v194_v27, inf  ;;  %v205_v41 = vand.u32 2147483648, %v194_v27  ;;  %vm204_vm14 = vcmp.eq.f32.partialorder %v194_v27, 0.0 }
  0x87   :  { %v533_v28 = vpop.eup %532 }
  0x88   :  { %v196_v36 = vmul.f32 %v533_v28, %v194_v27 }
  0x8a   :  { %v197_v37 = vmul.f32 %v533_v28, %v196_v36 }
  0x8c   :  { %v198_v38 = vmul.f32 0.5, %v197_v37 }
  0x8e   :  { %v199_v39 = vsub.f32 1.5, %v198_v38 }
  0x90   :  { %v200_v40 = vmul.f32 %v533_v28, %v199_v39 }
  0x92   :  { %v201_v42 = vmul.f32 %v200_v40, %v194_v27 }
  0x94   :  { %v203_v43 = vsel %vm202_vm13, %v194_v27, %v201_v42 }
  0x95   :  { %v206_v44 = vsel %vm204_vm14, %v205_v41, %v203_v43 }
  0x96   :  { %v506_v45 = vadd.f32 -1.0, %v206_v44 }
  0x98   :  { %v208_v46 = vadd.f32 %v506_v45, %v183_v16 }
  0x9a   :  { %v209_v47 = vmul.f32 %v208_v46, %v836_v30  ;;  %v211_v48 = vmul.f32 %v208_v46, %v839_v31  ;;  %v213_v49 = vmul.f32 %v208_v46, %v842_v32 }
  0x9c   :  { %v210_v50 = vadd.f32 %v209_v47, %v844_v33  ;;  %v212_v51 = vadd.f32 %v211_v48, %v846_v34  ;;  %v214_v52 = vadd.f32 %v213_v49, %v848_v35 }
  0x9e   :  { %v215_v53 = vmul.f32 %v210_v50, %v210_v50  ;;  %v216_v54 = vmul.f32 %v212_v51, %v212_v51  ;;  %v218_v55 = vmul.f32 %v214_v52, %v214_v52 }
  0xa0   :  { %v217_v56 = vadd.f32 %v216_v54, %v215_v53 }
  0xa2   :  { %v219_v57 = vadd.f32 %v218_v55, %v217_v56 }
  0xa4   :  { %534 = vrsqrt.f32 %v219_v57  ;;  %vm227_vm15 = vcmp.eq.f32.partialorder %v219_v57, inf  ;;  %v230_v0 = vand.u32 2147483648, %v219_v57  ;;  %vm229_vm0 = vcmp.eq.f32.partialorder %v219_v57, 0.0 }
  0xaa   :  { %v535_v58 = vpop.eup %534 }
  0xab   :  { %v221_v59 = vmul.f32 %v535_v58, %v219_v57 }
  0xad   :  { %v222_v60 = vmul.f32 %v535_v58, %v221_v59 }
  0xaf   :  { %v223_v61 = vmul.f32 0.5, %v222_v60 }
  0xb1   :  { %v224_v62 = vsub.f32 1.5, %v223_v61 }
  0xb3   :  { %v225_v63 = vmul.f32 %v535_v58, %v224_v62 }
  0xb5   :  { %v226_v1 = vmul.f32 %v225_v63, %v219_v57 }
  0xb7   :  { %v228_v2 = vsel %vm227_vm15, %v219_v57, %v226_v1 }
  0xb8   :  { %v231_v3 = vsel %vm229_vm0, %v230_v0, %v228_v2 }
  0xb9   :  { %v507_v4 = vadd.f32 -1.0, %v231_v3 }
  0xbb   :  { %v233_v5 = vadd.f32 %v507_v4, %v208_v46 }
  0xbd   :  { %v234_v6 = vmul.f32 %v233_v5, %v836_v30  ;;  %v236_v7 = vmul.f32 %v233_v5, %v839_v31  ;;  %v238_v8 = vmul.f32 %v233_v5, %v842_v32 }
  0xbf   :  { %v235_v9 = vadd.f32 %v234_v6, %v844_v33  ;;  %v237_v10 = vadd.f32 %v236_v7, %v846_v34  ;;  %v239_v11 = vadd.f32 %v238_v8, %v848_v35 }
  0xc1   :  { %v240_v12 = vmul.f32 %v235_v9, %v235_v9  ;;  %v241_v13 = vmul.f32 %v237_v10, %v237_v10  ;;  %v243_v14 = vmul.f32 %v239_v11, %v239_v11 }
  0xc3   :  { %v242_v15 = vadd.f32 %v241_v13, %v240_v12 }
  0xc5   :  { %v244_v16 = vadd.f32 %v243_v14, %v242_v15 }
  0xc7   :  { %536 = vrsqrt.f32 %v244_v16  ;;  %vm252_vm1 = vcmp.eq.f32.partialorder %v244_v16, inf  ;;  %v255_v23 = vand.u32 2147483648, %v244_v16  ;;  %vm254_vm2 = vcmp.eq.f32.partialorder %v244_v16, 0.0 }
  0xcd   :  { %v537_v17 = vpop.eup %536 }
  0xce   :  { %v246_v18 = vmul.f32 %v537_v17, %v244_v16 }
  0xd0   :  { %v247_v19 = vmul.f32 %v537_v17, %v246_v18 }
  0xd2   :  { %v248_v20 = vmul.f32 0.5, %v247_v19 }
  0xd4   :  { %v249_v21 = vsub.f32 1.5, %v248_v20 }
  0xd6   :  { %v250_v22 = vmul.f32 %v537_v17, %v249_v21 }
  0xd8   :  { %v251_v24 = vmul.f32 %v250_v22, %v244_v16 }
  0xda   :  { %v253_v25 = vsel %vm252_vm1, %v244_v16, %v251_v24 }
  0xdb   :  { %v256_v26 = vsel %vm254_vm2, %v255_v23, %v253_v25 }
  0xdc   :  { %v508_v27 = vadd.f32 -1.0, %v256_v26 }
  0xde   :  { %v258_v28 = vadd.f32 %v508_v27, %v233_v5 }
  0xe0   :  { %v259_v36 = vmul.f32 %v258_v28, %v836_v30  ;;  %v261_v37 = vmul.f32 %v258_v28, %v839_v31  ;;  %v263_v38 = vmul.f32 %v258_v28, %v842_v32 }
  0xe2   :  { %v260_v39 = vadd.f32 %v259_v36, %v844_v33  ;;  %v262_v40 = vadd.f32 %v261_v37, %v846_v34  ;;  %v264_v41 = vadd.f32 %v263_v38, %v848_v35 }
  0xe4   :  { %v265_v42 = vmul.f32 %v260_v39, %v260_v39  ;;  %v266_v43 = vmul.f32 %v262_v40, %v262_v40  ;;  %v268_v44 = vmul.f32 %v264_v41, %v264_v41 }
  0xe6   :  { %v267_v45 = vadd.f32 %v266_v43, %v265_v42 }
  0xe8   :  { %v269_v46 = vadd.f32 %v268_v44, %v267_v45 }
  0xea   :  { %538 = vrsqrt.f32 %v269_v46  ;;  %vm277_vm3 = vcmp.eq.f32.partialorder %v269_v46, inf  ;;  %v280_v53 = vand.u32 2147483648, %v269_v46  ;;  %vm279_vm4 = vcmp.eq.f32.partialorder %v269_v46, 0.0 }
  0xf0   :  { %v539_v47 = vpop.eup %538 }
  0xf1   :  { %v271_v48 = vmul.f32 %v539_v47, %v269_v46 }
  0xf3   :  { %v272_v49 = vmul.f32 %v539_v47, %v271_v48 }
  0xf5   :  { %v273_v50 = vmul.f32 0.5, %v272_v49 }
  0xf7   :  { %v274_v51 = vsub.f32 1.5, %v273_v50 }
  0xf9   :  { %v275_v52 = vmul.f32 %v539_v47, %v274_v51 }
  0xfb   :  { %v276_v54 = vmul.f32 %v275_v52, %v269_v46 }
  0xfd   :  { %v278_v55 = vsel %vm277_vm3, %v269_v46, %v276_v54 }
  0xfe   :  { %v281_v56 = vsel %vm279_vm4, %v280_v53, %v278_v55 }
  0xff   :  { %v509_v57 = vadd.f32 -1.0, %v281_v56 }
 0x101   :  { %v283_v58 = vadd.f32 %v509_v57, %v258_v28 }
 0x103   :  { %v284_v59 = vmul.f32 %v283_v58, %v836_v30  ;;  %v286_v60 = vmul.f32 %v283_v58, %v839_v31  ;;  %v288_v61 = vmul.f32 %v283_v58, %v842_v32 }
 0x105   :  { %v285_v62 = vadd.f32 %v284_v59, %v844_v33  ;;  %v287_v63 = vadd.f32 %v286_v60, %v846_v34  ;;  %v289_v0 = vadd.f32 %v288_v61, %v848_v35 }
 0x107   :  { %v290_v1 = vmul.f32 %v285_v62, %v285_v62  ;;  %v291_v2 = vmul.f32 %v287_v63, %v287_v63  ;;  %v293_v3 = vmul.f32 %v289_v0, %v289_v0 }
 0x109   :  { %v292_v4 = vadd.f32 %v291_v2, %v290_v1 }
 0x10b   :  { %v294_v5 = vadd.f32 %v293_v3, %v292_v4 }
 0x10d   :  { %540 = vrsqrt.f32 %v294_v5  ;;  %vm302_vm5 = vcmp.eq.f32.partialorder %v294_v5, inf  ;;  %v305_v12 = vand.u32 2147483648, %v294_v5  ;;  %vm304_vm6 = vcmp.eq.f32.partialorder %v294_v5, 0.0 }
 0x113   :  { %v541_v6 = vpop.eup %540 }
 0x114   :  { %v296_v7 = vmul.f32 %v541_v6, %v294_v5 }
 0x116   :  { %v297_v8 = vmul.f32 %v541_v6, %v296_v7 }
 0x118   :  { %v298_v9 = vmul.f32 0.5, %v297_v8 }
 0x11a   :  { %v299_v10 = vsub.f32 1.5, %v298_v9 }
 0x11c   :  { %v300_v11 = vmul.f32 %v541_v6, %v299_v10 }
 0x11e   :  { %v301_v13 = vmul.f32 %v300_v11, %v294_v5 }
 0x120   :  { %v303_v14 = vsel %vm302_vm5, %v294_v5, %v301_v13 }
 0x121   :  { %v306_v15 = vsel %vm304_vm6, %v305_v12, %v303_v14 }
 0x122   :  { %v510_v16 = vadd.f32 -1.0, %v306_v15 }
 0x124   :  { %v308_v17 = vadd.f32 %v510_v16, %v283_v58 }
 0x126   :  { %v309_v18 = vmul.f32 %v308_v17, %v836_v30  ;;  %v311_v19 = vmul.f32 %v308_v17, %v839_v31  ;;  %v313_v20 = vmul.f32 %v308_v17, %v842_v32 }
 0x128   :  { %v310_v21 = vadd.f32 %v309_v18, %v844_v33  ;;  %v312_v22 = vadd.f32 %v311_v19, %v846_v34  ;;  %v314_v23 = vadd.f32 %v313_v20, %v848_v35 }
 0x12a   :  { %v315_v24 = vmul.f32 %v310_v21, %v310_v21  ;;  %v316_v25 = vmul.f32 %v312_v22, %v312_v22  ;;  %v318_v26 = vmul.f32 %v314_v23, %v314_v23 }
 0x12c   :  { %v317_v27 = vadd.f32 %v316_v25, %v315_v24 }
 0x12e   :  { %v319_v28 = vadd.f32 %v318_v26, %v317_v27 }
 0x130   :  { %542 = vrsqrt.f32 %v319_v28  ;;  %vm327_vm7 = vcmp.eq.f32.partialorder %v319_v28, inf  ;;  %v330_v42 = vand.u32 2147483648, %v319_v28  ;;  %vm329_vm8 = vcmp.eq.f32.partialorder %v319_v28, 0.0 }
 0x136   :  { %v543_v36 = vpop.eup %542 }
 0x137   :  { %v321_v37 = vmul.f32 %v543_v36, %v319_v28 }
 0x139   :  { %v322_v38 = vmul.f32 %v543_v36, %v321_v37 }
 0x13b   :  { %v323_v39 = vmul.f32 0.5, %v322_v38 }
 0x13d   :  { %v324_v40 = vsub.f32 1.5, %v323_v39 }
 0x13f   :  { %v325_v41 = vmul.f32 %v543_v36, %v324_v40 }
 0x141   :  { %v326_v43 = vmul.f32 %v325_v41, %v319_v28 }
 0x143   :  { %v328_v44 = vsel %vm327_vm7, %v319_v28, %v326_v43 }
 0x144   :  { %v331_v45 = vsel %vm329_vm8, %v330_v42, %v328_v44 }
 0x145   :  { %v511_v46 = vadd.f32 -1.0, %v331_v45 }
 0x147   :  { %v333_v47 = vadd.f32 %v511_v46, %v308_v17 }
 0x149   :  { %v334_v48 = vmul.f32 %v333_v47, %v836_v30  ;;  %v336_v49 = vmul.f32 %v333_v47, %v839_v31  ;;  %v338_v50 = vmul.f32 %v333_v47, %v842_v32 }
 0x14b   :  { %v335_v51 = vadd.f32 %v334_v48, %v844_v33  ;;  %v337_v52 = vadd.f32 %v336_v49, %v846_v34  ;;  %v339_v53 = vadd.f32 %v338_v50, %v848_v35 }
 0x14d   :  { %v340_v54 = vmul.f32 %v335_v51, %v335_v51  ;;  %v341_v55 = vmul.f32 %v337_v52, %v337_v52  ;;  %v343_v56 = vmul.f32 %v339_v53, %v339_v53 }
 0x14f   :  { %v342_v57 = vadd.f32 %v341_v55, %v340_v54  ;;  %v775_v54 = vmov 0.0  }
 0x151   :  { %v344_v58 = vadd.f32 %v343_v56, %v342_v57 }
 0x153   :  { %544 = vrsqrt.f32 %v344_v58  ;;  %vm352_vm9 = vcmp.eq.f32.partialorder %v344_v58, inf  ;;  %v355_v1 = vand.u32 2147483648, %v344_v58  ;;  %vm354_vm10 = vcmp.eq.f32.partialorder %v344_v58, 0.0 }
 0x159   :  { %v545_v59 = vpop.eup %544 }
 0x15a   :  { %v346_v60 = vmul.f32 %v545_v59, %v344_v58 }
 0x15c   :  { %v347_v61 = vmul.f32 %v545_v59, %v346_v60 }
 0x15e   :  { %v348_v62 = vmul.f32 0.5, %v347_v61 }
 0x160   :  { %v349_v63 = vsub.f32 1.5, %v348_v62 }
 0x162   :  { %v350_v0 = vmul.f32 %v545_v59, %v349_v63 }
 0x164   :  { %v351_v2 = vmul.f32 %v350_v0, %v344_v58 }
 0x166   :  { %v353_v3 = vsel %vm352_vm9, %v344_v58, %v351_v2 }
 0x167   :  { %v356_v4 = vsel %vm354_vm10, %v355_v1, %v353_v3 }
 0x168   :  { %v512_v5 = vadd.f32 -1.0, %v356_v4 }
 0x16a   :  { %v358_v6 = vadd.f32 %v512_v5, %v333_v47 }
 0x16c   :  { %v359_v7 = vmul.f32 %v358_v6, %v836_v30  ;;  %v361_v8 = vmul.f32 %v358_v6, %v839_v31  ;;  %v363_v9 = vmul.f32 %v358_v6, %v842_v32 }
 0x16e   :  { %v360_v10 = vadd.f32 %v359_v7, %v844_v33  ;;  %v362_v11 = vadd.f32 %v361_v8, %v846_v34  ;;  %v364_v12 = vadd.f32 %v363_v9, %v848_v35 }
 0x170   :  { %v365_v13 = vmul.f32 %v360_v10, %v360_v10  ;;  %v366_v14 = vmul.f32 %v362_v11, %v362_v11  ;;  %v368_v15 = vmul.f32 %v364_v12, %v364_v12 }
 0x172   :  { %v367_v16 = vadd.f32 %v366_v14, %v365_v13 }
 0x174   :  { %v369_v17 = vadd.f32 %v368_v15, %v367_v16 }
 0x176   :  { %546 = vrsqrt.f32 %v369_v17  ;;  %vm377_vm11 = vcmp.eq.f32.partialorder %v369_v17, inf  ;;  %v380_v24 = vand.u32 2147483648, %v369_v17  ;;  %vm379_vm12 = vcmp.eq.f32.partialorder %v369_v17, 0.0 }
 0x17c   :  { %v547_v18 = vpop.eup %546 }
 0x17d   :  { %v371_v19 = vmul.f32 %v547_v18, %v369_v17 }
 0x17f   :  { %v372_v20 = vmul.f32 %v547_v18, %v371_v19 }
 0x181   :  { %v373_v21 = vmul.f32 0.5, %v372_v20 }
 0x183   :  { %v374_v22 = vsub.f32 1.5, %v373_v21 }
 0x185   :  { %v375_v23 = vmul.f32 %v547_v18, %v374_v22 }
 0x187   :  { %v376_v25 = vmul.f32 %v375_v23, %v369_v17 }
 0x189   :  { %v378_v26 = vsel %vm377_vm11, %v369_v17, %v376_v25 }
 0x18a   :  { %v381_v27 = vsel %vm379_vm12, %v380_v24, %v378_v26 }
 0x18b   :  { %v513_v28 = vadd.f32 -1.0, %v381_v27 }
 0x18d   :  { %v383_v36 = vadd.f32 %v513_v28, %v358_v6 }
 0x18f   :  { %v386_v37 = vmul.f32 %v383_v36, %v839_v31  ;;  %v411_v38 = vmul.f32 %v383_v36, %v833_v29  ;;  %v384_v39 = vmul.f32 %v383_v36, %v836_v30  ;;  %v388_v40 = vmul.f32 %v383_v36, %v842_v32 }
 0x191   :  { %v387_v41 = vadd.f32 %v386_v37, %v846_v34  ;;  %412 = vst [vmem:[#allocation14] sm:$0xff] %v411_v38  ;;  %v385_v31 = vadd.f32 %v384_v39, %v844_v33  ;;  %v389_v29 = vadd.f32 %v388_v40, %v848_v35 }
 0x192   :  { %461 = dma.vmem_to_hbm [thread:$0]  %s457_s10, 128, %s459_s13, [#allocation15]  }
 0x193   :  { %v391_v30 = vmul.f32 %v387_v41, %v387_v41  ;;  %409 = vst [vmem:[#allocation11] sm:$0xff] %v387_v41  ;;  %v390_v32 = vmul.f32 %v385_v31, %v385_v31  ;;  %v393_v42 = vmul.f32 %v389_v29, %v389_v29 }
 0x194   :  { %408 = vst [vmem:[#allocation10] sm:$0xff] %v385_v31  ;;  %439 = dma.vmem_to_hbm [thread:$0]  %s435_s27, 128, %s437_s30, [#allocation12]  }
 0x195   :  { %v392_v43 = vadd.f32 %v391_v30, %v390_v32  ;;  %410 = vst [vmem:[#allocation13] sm:$0xff] %v389_v29  ;;  %428 = dma.vmem_to_hbm [thread:$0]  %s424_s15, 128, %s426_s2, [#allocation4]  }
 0x196   :  { %450 = dma.vmem_to_hbm [thread:$0]  %s446_s7, 128, %s448_s20, [#allocation12]  }
 0x197   :  { %v394_v34 = vadd.f32 %v393_v42, %v392_v43 }
 0x199   :  { %548 = vrsqrt.f32 %v394_v34  ;;  %vm402_vm13 = vcmp.eq.f32.partialorder %v394_v34, inf  ;;  %v405_v48 = vand.u32 2147483648, %v394_v34  ;;  %vm404_vm14 = vcmp.eq.f32.partialorder %v394_v34, 0.0 }
 0x19f   :  { %v549_v33 = vpop.eup %548 }
 0x1a0   :  { %v396_v35 = vmul.f32 %v549_v33, %v394_v34 }
 0x1a2   :  { %v397_v44 = vmul.f32 %v549_v33, %v396_v35 }
 0x1a4   :  { %v398_v45 = vmul.f32 0.5, %v397_v44 }
 0x1a6   :  { %v399_v46 = vsub.f32 1.5, %v398_v45 }
 0x1a8   :  { %v400_v47 = vmul.f32 %v549_v33, %v399_v46 }
 0x1aa   :  { %v401_v49 = vmul.f32 %v400_v47, %v394_v34 }
 0x1ac   :  { %v403_v50 = vsel %vm402_vm13, %v394_v34, %v401_v49 }
 0x1ad   :  { %v406_v51 = vsel %vm404_vm14, %v405_v48, %v403_v50 }
 0x1ae   :  { %v514_v52 = vadd.f32 -1.0, %v406_v51 }
 0x1b0   :  { %v413_v53 = vand.u32 2147483647, %v514_v52 }
 0x1b2   :  { %vm414_vm15 = vcmp.lt.f32.partialorder %v413_v53, 5e-05 }
 0x1b3   :  { %v515_v55 = vsel %vm414_vm15, 1.0, %v775_v54 }
 0x1b4   :  { %417 = vst [vmem:[#allocation16] sm:$0xff] %v515_v55 }
 0x1b5   :  { %472 = dma.vmem_to_hbm [thread:$0]  %s468_s6, 128, %s470_s1, [#allocation15]  }
 0x1b6   :  { %760 = dma.done.wait [#allocation4], 128  }
 0x1b7   :  { %761 = vsyncadd [#allocation4], 4294967168 }
 0x1b8   :  { %762 = dma.done.wait [#allocation12], 256  }
 0x1b9   :  { %763 = vsyncadd [#allocation12], 4294967040 }
 0x1ba   :  { %764 = dma.done.wait [#allocation15], 256  }
 0x1bb   :  { %765 = vsyncadd [#allocation15], 4294967040 }
 0x1bc   :  { %493 = vsyncpa [#allocation3], 1 }
 0x1bd   :  { %494 = vsyncpa [#allocation8], 1 }
 0x1be   :  { %495 = vsyncpa [#allocation4], 1 }
 0x1bf   :  { %496 = vsyncpa [#allocation12], 1 }
 0x1c0   :  { %497 = vsyncpa [#allocation15], 1 }
 0x1c1   :  { %498 = vsyncpa [#allocation5], 1 }

</bundles_post_ra>
